<compile_context>
chip_gen: v5e
topology: v5e:2x2
jax: 0.10.0
libtpu: 0.0.40
codegen_flags: <defaults>
</compile_context>

<pallas_src>
import functools

import jax
import jax.numpy as jnp
from jax.experimental import pallas as pl
from jax.experimental.pallas import tpu as pltpu


def _sigmoid(x):
    # exp runs on the EUP; the divide touches only a tiny (N, 2U) tile.
    return 1.0 / (1.0 + jnp.exp(-x))


# ---------------------------------------------------------------------------
# Kernel: one grid step handles one batch sample b (grid=(B,), "parallel")
# ---------------------------------------------------------------------------
def _dcgru_cell_kernel(x_ref, hxb_ref, hxq_ref, adjb_ref, adjl_ref,
                       wrux_ref, wruh_ref, bru_ref, wcx_ref, wch_ref, bc_ref,
                       out_ref, *, num_nodes, num_units, input_dim,
                       max_diffusion_step):
    N, U, D, K = num_nodes, num_units, input_dim, max_diffusion_step
    f32 = jnp.float32

    x_b = x_ref[0]          # (N, D)    this sample's input features
    hx_b = hxb_ref[0]       # (N, U)    this sample's hidden state
    hx_q = hxq_ref[...]     # (N, B*U)  full hx reshaped (original module quirk)

    # --- random-walk supports: (D^-1 (A + I))^T  (tiny on-chip prologue) -----
    row = jax.lax.broadcasted_iota(jnp.int32, (N, N), 0)
    col = jax.lax.broadcasted_iota(jnp.int32, (N, N), 1)
    eye = (row == col).astype(f32)

    def rw_support_t(a):
        a = a + eye
        d = jnp.sum(a, axis=1, keepdims=True)
        d_inv = 1.0 / d
        d_inv = jnp.where(jnp.isinf(d_inv), 0.0, d_inv)
        return (d_inv * a).T                      # XLU transpose

    sup_b = rw_support_t(adjb_ref[0])    # this sample's support (r/u gates)
    sup_l = rw_support_t(adjl_ref[0])    # LAST sample's support (candidate, quirk)

    # --- diffusion fused with the weight matmul -------------------------------
    # X_0 = x0; X_1 = S X_0; X_m = 2 S X_{m-1} - X_{m-2}.  Accumulate
    # acc += X_m @ W[m] step-by-step (weights are step-major 3-D from the
    # wrapper) so the (rows, S*M) feature matrix is never materialized.
    def fused_gconv(support, parts, out_width):
        acc = jnp.zeros((N, out_width), f32)
        for x0, w_ref in parts:               # input-part and state-part of x0
            xm_2 = x0
            acc = acc + jnp.dot(xm_2, w_ref[0], preferred_element_type=f32)
            if K > 0:
                xm_1 = jnp.dot(support, xm_2, preferred_element_type=f32)
                acc = acc + jnp.dot(xm_1, w_ref[1], preferred_element_type=f32)
                for m in range(2, K + 1):
                    xm = 2.0 * jnp.dot(support, xm_1,
                                       preferred_element_type=f32) - xm_2
                    acc = acc + jnp.dot(xm, w_ref[m], preferred_element_type=f32)
                    xm_2, xm_1 = xm_1, xm
        return acc

    # --- r / u gates: ONE fused matmul with a 2U-wide output (bias_start=1) ---
    ru = _sigmoid(
        fused_gconv(sup_b, [(x_b, wrux_ref), (hx_q, wruh_ref)], 2 * U)
        + bru_ref[...])                               # (N, 2U)
    r = ru[:, :U]
    u = ru[:, U:]

    # --- candidate state: gconv with the LAST sample's support, state=r*hx ----
    c = jnp.tanh(
        fused_gconv(sup_l, [(x_b, wcx_ref), (r * hx_b, wch_ref)], U)
        + bc_ref[...])                                # (N, U)

    out_ref[0] = u * hx_b + (1.0 - u) * c


# ---------------------------------------------------------------------------
# Wrapper: layout plumbing (reshapes, step-major weight split) + pallas_call
# ---------------------------------------------------------------------------
def dcgru_cell_forward(inputs, hx, adj, params, *, num_units,
                       max_diffusion_step, num_nodes):
    B = inputs.shape[0]
    N, U, K = num_nodes, num_units, max_diffusion_step
    M = K + 1
    D = inputs.shape[1] // N
    f32 = jnp.float32

    x3 = inputs.reshape(B, N, D).astype(f32)
    hx3 = hx.reshape(B, N, U).astype(f32)
    hx_q = hx.reshape(N, B * U).astype(f32)      # torch.reshape(hx,(1,N,-1)) quirk
    adj = adj.astype(f32)

    # Torch gconv weight row ordering is s*M + m.  Split each weight into its
    # input-feature rows and state rows and re-order to step-major (M, s, out)
    # so the kernel can accumulate X_m @ W[m] inside the diffusion recurrence.
    def split_step_major(w, s_x, s_h):
        out = w.shape[1]
        w3 = w.reshape(s_x + s_h, M, out)                         # [s, m, out]
        w_x = jnp.transpose(w3[:s_x], (1, 0, 2))                  # (M, s_x, out)
        w_h = jnp.transpose(w3[s_x:], (1, 0, 2))                  # (M, s_h, out)
        return w_x, w_h

    w_ru_x, w_ru_h = split_step_major(params["w_ru"].astype(f32), D, B * U)
    w_c_x, w_c_h = split_step_major(params["w_c"].astype(f32), D, U)
    b_ru = params["b_ru"].astype(f32).reshape(1, 2 * U)
    b_c = params["b_c"].astype(f32).reshape(1, U)

    kernel = functools.partial(
        _dcgru_cell_kernel, num_nodes=N, num_units=U, input_dim=D,
        max_diffusion_step=K)

    last = B - 1
    in_specs = [
        pl.BlockSpec((1, N, D), lambda b: (b, 0, 0)),             # x_b
        pl.BlockSpec((1, N, U), lambda b: (b, 0, 0)),             # hx_b
        pl.BlockSpec((N, B * U), lambda b: (0, 0)),               # hx_q (resident)
        pl.BlockSpec((1, N, N), lambda b: (b, 0, 0)),             # adj[b]
        pl.BlockSpec((1, N, N), lambda b: (last, 0, 0)),          # adj[B-1]
        pl.BlockSpec((M, D, 2 * U), lambda b: (0, 0, 0)),         # w_ru input rows
        pl.BlockSpec((M, B * U, 2 * U), lambda b: (0, 0, 0)),     # w_ru state rows
        pl.BlockSpec((1, 2 * U), lambda b: (0, 0)),               # b_ru
        pl.BlockSpec((M, D, U), lambda b: (0, 0, 0)),             # w_c input rows
        pl.BlockSpec((M, U, U), lambda b: (0, 0, 0)),             # w_c state rows
        pl.BlockSpec((1, U), lambda b: (0, 0)),                   # b_c
    ]
    out_spec = pl.BlockSpec((1, N, U), lambda b: (b, 0, 0))

    # VMEM budget: double-buffered per-sample tiles + resident weights/state +
    # diffusion temporaries, with headroom; capped at 64 MiB (v7x physical).
    fp = 4
    per_sample = fp * (N * D + N * U + 2 * N * N + N * U)
    resident = fp * (N * B * U + M * D * 2 * U + M * B * U * 2 * U + 2 * U
                     + M * D * U + M * U * U + U)
    scratch = fp * (4 * N * B * U + 2 * N * N + 4 * N * max(2 * U, D))
    vmem_limit = int(min(max(2 * per_sample + resident + scratch + (8 << 20),
                             32 << 20), 64 << 20))

    new_state = pl.pallas_call(
        kernel,
        out_shape=jax.ShapeDtypeStruct((B, N, U), f32),
        grid=(B,),
        in_specs=in_specs,
        out_specs=out_spec,
        compiler_params=pltpu.CompilerParams(
            dimension_semantics=("parallel",),
            vmem_limit_bytes=vmem_limit),
    )(x3, hx3, hx_q, adj, adj, w_ru_x, w_ru_h, b_ru, w_c_x, w_c_h, b_c)

    return new_state.reshape(B, N * U)     # module output: (B, num_nodes*units)


# ---------------------------------------------------------------------------
# Parameters (mirrors LayerParams: xavier_normal weights, constant biases)
# ---------------------------------------------------------------------------
def make_params(key, *, batch, num_nodes, input_dim, num_units,
                max_diffusion_step):
    B, D, U, K = batch, input_dim, num_units, max_diffusion_step
    M = K + 1
    S1 = D + B * U      # input_size seen by the r/u gconv (hx-reshape quirk)
    S2 = D + U
    k1, k2 = jax.random.split(key)

    def xavier_normal(k, shape):
        std = (2.0 / (shape[0] + shape[1])) ** 0.5
        return std * jax.random.normal(k, shape, dtype=jnp.float32)

    return {
        "w_ru": xavier_normal(k1, (S1 * M, 2 * U)),
        "b_ru": jnp.full((2 * U,), 1.0, jnp.float32),    # bias_start = 1.0
        "w_c": xavier_normal(k2, (S2 * M, U)),
        "b_c": jnp.zeros((U,), jnp.float32),             # bias_start = 0.0
    }


# ---------------------------------------------------------------------------
# Pure-JAX reference that mirrors the PyTorch code line-by-line
# ---------------------------------------------------------------------------
def _reference(inputs, hx, adj, params, *, num_units, max_diffusion_step,
               num_nodes):
    B = inputs.shape[0]
    N, U, K = num_nodes, num_units, max_diffusion_step
    M = K + 1
    hp = jax.lax.Precision.HIGHEST

    def random_walk_T(a):
        a = a + jnp.eye(N, dtype=a.dtype)
        d = jnp.sum(a, axis=1)
        d_inv = 1.0 / d
        d_inv = jnp.where(jnp.isinf(d_inv), 0.0, d_inv)
        return (d_inv[:, None] * a).T

    def gconv(inp, support, state, weights, biases):
        bsz = inp.shape[0]
        inp = inp.reshape(bsz, N, -1)
        st = state.reshape(bsz, N, -1)
        x = jnp.concatenate([inp, st], axis=2)
        s = x.shape[2]
        x0 = jnp.transpose(x, (1, 2, 0)).reshape(N, s * bsz)
        xs = [x0]
        if K > 0:
            x1 = jnp.matmul(support, x0, precision=hp)
            xs.append(x1)
            xk_2, xk_1 = x0, x1
            for _ in range(2, K + 1):
                x2 = 2.0 * jnp.matmul(support, xk_1, precision=hp) - xk_2
                xs.append(x2)
                xk_2, xk_1 = xk_1, x2
        xx = jnp.stack(xs, axis=0).reshape(M, N, s, bsz)
        xx = jnp.transpose(xx, (3, 1, 2, 0)).reshape(bsz * N, s * M)
        out = jnp.matmul(xx, weights, precision=hp) + biases
        return out.reshape(bsz, N * weights.shape[1])

    values = []
    for i in range(B):
        support = random_walk_T(adj[i])
        values.append(gconv(inputs[i:i + 1], support, hx,
                            params["w_ru"], params["b_ru"]))
    value = _sigmoid(jnp.concatenate(values, axis=0)).reshape(-1, N, 2 * U)
    r = value[..., :U].reshape(-1, N * U)
    u = value[..., U:].reshape(-1, N * U)

    support_last = random_walk_T(adj[B - 1])
    c = jnp.tanh(gconv(inputs, support_last, r * hx,
                       params["w_c"], params["b_c"]))
    return u * hx + (1.0 - u) * c


if __name__ == "__main__":
    # batch, num_nodes, input_dim, rnn_units (num_units), max_diffusion_step
    B, N, D, U, K = 2, 8, 4, 8, 2
    key = jax.random.PRNGKey(0)
    k_in, k_hx, k_adj, k_p = jax.random.split(key, 4)
    inputs = jax.random.normal(k_in, (B, N * D), dtype=jnp.float32)
    hx = jax.random.normal(k_hx, (B, N * U), dtype=jnp.float32)
    adj = jax.random.uniform(k_adj, (B, N, N), dtype=jnp.float32)
    params = make_params(k_p, batch=B, num_nodes=N, input_dim=D, num_units=U,
                         max_diffusion_step=K)

    new_state = dcgru_cell_forward(inputs, hx, adj, params, num_units=U,
                                   max_diffusion_step=K, num_nodes=N)
    new_state = jax.block_until_ready(new_state)

    ref = _reference(inputs, hx, adj, params, num_units=U,
                     max_diffusion_step=K, num_nodes=N)
    assert new_state.shape == (B, N * U)
    err = float(jnp.max(jnp.abs(new_state - ref)))
    assert jnp.allclose(new_state, ref, atol=1e-4, rtol=1e-4), err

    print("KERNEL_OK")
</pallas_src>

<mosaic_0001>
module attributes {stable_mosaic.version = 11 : i64} {
  func.func @_dcgru_cell_kernel(%arg0: i32, %arg1: memref<1x8x4xf32, #tpu.memory_space<vmem>>, %arg2: memref<1x8x8xf32, #tpu.memory_space<vmem>>, %arg3: memref<8x16xf32, #tpu.memory_space<vmem>>, %arg4: memref<1x8x8xf32, #tpu.memory_space<vmem>>, %arg5: memref<1x8x8xf32, #tpu.memory_space<vmem>>, %arg6: memref<3x4x16xf32, #tpu.memory_space<vmem>>, %arg7: memref<3x16x16xf32, #tpu.memory_space<vmem>>, %arg8: memref<1x16xf32, #tpu.memory_space<vmem>>, %arg9: memref<3x4x8xf32, #tpu.memory_space<vmem>>, %arg10: memref<3x8x8xf32, #tpu.memory_space<vmem>>, %arg11: memref<1x8xf32, #tpu.memory_space<vmem>>, %arg12: memref<1x8x8xf32, #tpu.memory_space<vmem>>) attributes {dimension_semantics = [#tpu.dimension_semantics<parallel>], iteration_bounds = array<i64: 2>, scalar_prefetch = 0 : i64, scratch_operands = 0 : i64, tpu.core_type = #tpu.core_type<tc>, window_params = [{transform_indices = @transform_0, window_bounds = array<i64: 1, 8, 4>}, {transform_indices = @transform_1, window_bounds = array<i64: 1, 8, 8>}, {pipeline_mode = #tpu.pipeline_mode<synchronous>, transform_indices = @transform_2, window_bounds = array<i64: 8, 16>}, {transform_indices = @transform_3, window_bounds = array<i64: 1, 8, 8>}, {transform_indices = @transform_4, window_bounds = array<i64: 1, 8, 8>}, {pipeline_mode = #tpu.pipeline_mode<synchronous>, transform_indices = @transform_5, window_bounds = array<i64: 3, 4, 16>}, {pipeline_mode = #tpu.pipeline_mode<synchronous>, transform_indices = @transform_6, window_bounds = array<i64: 3, 16, 16>}, {pipeline_mode = #tpu.pipeline_mode<synchronous>, transform_indices = @transform_7, window_bounds = array<i64: 1, 16>}, {pipeline_mode = #tpu.pipeline_mode<synchronous>, transform_indices = @transform_8, window_bounds = array<i64: 3, 4, 8>}, {pipeline_mode = #tpu.pipeline_mode<synchronous>, transform_indices = @transform_9, window_bounds = array<i64: 3, 8, 8>}, {pipeline_mode = #tpu.pipeline_mode<synchronous>, transform_indices = @transform_10, window_bounds = array<i64: 1, 8>}, {transform_indices = @transform_11, window_bounds = array<i64: 1, 8, 8>}]} {
    %c0 = arith.constant 0 : index
    %c0_0 = arith.constant 0 : index
    %c0_1 = arith.constant 0 : index
    %0 = vector.load %arg1[%c0, %c0_0, %c0_1] : memref<1x8x4xf32, #tpu.memory_space<vmem>>, vector<1x8x4xf32>
    %1 = vector.shape_cast %0 : vector<1x8x4xf32> to vector<8x4xf32>
    %c0_2 = arith.constant 0 : index
    %c0_3 = arith.constant 0 : index
    %c0_4 = arith.constant 0 : index
    %2 = vector.load %arg2[%c0_2, %c0_3, %c0_4] : memref<1x8x8xf32, #tpu.memory_space<vmem>>, vector<1x8x8xf32>
    %3 = vector.shape_cast %2 : vector<1x8x8xf32> to vector<8x8xf32>
    %c0_5 = arith.constant 0 : index
    %c0_6 = arith.constant 0 : index
    %4 = vector.load %arg3[%c0_5, %c0_6] : memref<8x16xf32, #tpu.memory_space<vmem>>, vector<8x16xf32>
    %5 = tpu.iota {dimensions = array<i32: 0>} : vector<8x8xi32>
    %6 = tpu.iota {dimensions = array<i32: 1>} : vector<8x8xi32>
    %7 = arith.cmpi eq, %5, %6 : vector<8x8xi32>
    %8 = arith.extui %7 : vector<8x8xi1> to vector<8x8xi32>
    %9 = arith.sitofp %8 : vector<8x8xi32> to vector<8x8xf32>
    %c0_7 = arith.constant 0 : index
    %c0_8 = arith.constant 0 : index
    %c0_9 = arith.constant 0 : index
    %10 = vector.load %arg4[%c0_7, %c0_8, %c0_9] : memref<1x8x8xf32, #tpu.memory_space<vmem>>, vector<1x8x8xf32>
    %11 = vector.shape_cast %10 : vector<1x8x8xf32> to vector<8x8xf32>
    %12 = arith.addf %11, %9 : vector<8x8xf32>
    %cst = arith.constant dense<0.000000e+00> : vector<8xf32>
    %13 = vector.multi_reduction <add>, %12, %cst [1] : vector<8x8xf32> to vector<8xf32>
    %14 = vector.shape_cast %13 : vector<8xf32> to vector<8x1xf32>
    %cst_10 = arith.constant 1.000000e+00 : f32
    %15 = vector.broadcast %cst_10 : f32 to vector<8x1xf32>
    %16 = arith.divf %15, %14 : vector<8x1xf32>
    %17 = math.absf %16 : vector<8x1xf32>
    %cst_11 = arith.constant 0x7F800000 : f32
    %18 = vector.broadcast %cst_11 : f32 to vector<8x1xf32>
    %19 = arith.cmpf oeq, %17, %18 : vector<8x1xf32>
    %cst_12 = arith.constant 0.000000e+00 : f32
    %20 = vector.broadcast %cst_12 : f32 to vector<8x1xf32>
    %21 = arith.select %19, %20, %16 : vector<8x1xi1>, vector<8x1xf32>
    %22 = vector.broadcast %21 : vector<8x1xf32> to vector<8x8xf32>
    %23 = arith.mulf %22, %12 : vector<8x8xf32>
    %24 = tpu.transpose %23, [1, 0] : vector<8x8xf32> -> vector<8x8xf32>
    %c0_13 = arith.constant 0 : index
    %c0_14 = arith.constant 0 : index
    %c0_15 = arith.constant 0 : index
    %25 = vector.load %arg5[%c0_13, %c0_14, %c0_15] : memref<1x8x8xf32, #tpu.memory_space<vmem>>, vector<1x8x8xf32>
    %26 = vector.shape_cast %25 : vector<1x8x8xf32> to vector<8x8xf32>
    %27 = arith.addf %26, %9 : vector<8x8xf32>
    %cst_16 = arith.constant dense<0.000000e+00> : vector<8xf32>
    %28 = vector.multi_reduction <add>, %27, %cst_16 [1] : vector<8x8xf32> to vector<8xf32>
    %29 = vector.shape_cast %28 : vector<8xf32> to vector<8x1xf32>
    %cst_17 = arith.constant 1.000000e+00 : f32
    %30 = vector.broadcast %cst_17 : f32 to vector<8x1xf32>
    %31 = arith.divf %30, %29 : vector<8x1xf32>
    %32 = math.absf %31 : vector<8x1xf32>
    %cst_18 = arith.constant 0x7F800000 : f32
    %33 = vector.broadcast %cst_18 : f32 to vector<8x1xf32>
    %34 = arith.cmpf oeq, %32, %33 : vector<8x1xf32>
    %cst_19 = arith.constant 0.000000e+00 : f32
    %35 = vector.broadcast %cst_19 : f32 to vector<8x1xf32>
    %36 = arith.select %34, %35, %31 : vector<8x1xi1>, vector<8x1xf32>
    %37 = vector.broadcast %36 : vector<8x1xf32> to vector<8x8xf32>
    %38 = arith.mulf %37, %27 : vector<8x8xf32>
    %39 = tpu.transpose %38, [1, 0] : vector<8x8xf32> -> vector<8x8xf32>
    %cst_20 = arith.constant 0.000000e+00 : f32
    %40 = vector.broadcast %cst_20 : f32 to vector<8x16xf32>
    %c0_21 = arith.constant 0 : index
    %c0_22 = arith.constant 0 : index
    %c0_23 = arith.constant 0 : index
    %41 = vector.load %arg6[%c0_21, %c0_22, %c0_23] : memref<3x4x16xf32, #tpu.memory_space<vmem>>, vector<1x4x16xf32>
    %42 = vector.shape_cast %41 : vector<1x4x16xf32> to vector<4x16xf32>
    %cst_24 = arith.constant dense<0.000000e+00> : vector<8x16xf32>
    %43 = tpu.matmul %1, %42, %cst_24 {dimension_numbers = #tpu.dot_dimension_numbers<[1], [0], [0], [1], [0, 0, 1, 1], [], []>} : vector<8x4xf32>, vector<4x16xf32>, vector<8x16xf32> -> vector<8x16xf32>
    %44 = arith.addf %40, %43 : vector<8x16xf32>
    %cst_25 = arith.constant dense<0.000000e+00> : vector<8x4xf32>
    %45 = tpu.matmul %24, %1, %cst_25 {dimension_numbers = #tpu.dot_dimension_numbers<[1], [0], [0], [1], [0, 0, 1, 1], [], []>} : vector<8x8xf32>, vector<8x4xf32>, vector<8x4xf32> -> vector<8x4xf32>
    %c1 = arith.constant 1 : index
    %c0_26 = arith.constant 0 : index
    %c0_27 = arith.constant 0 : index
    %46 = vector.load %arg6[%c1, %c0_26, %c0_27] : memref<3x4x16xf32, #tpu.memory_space<vmem>>, vector<1x4x16xf32>
    %47 = vector.shape_cast %46 : vector<1x4x16xf32> to vector<4x16xf32>
    %cst_28 = arith.constant dense<0.000000e+00> : vector<8x16xf32>
    %48 = tpu.matmul %45, %47, %cst_28 {dimension_numbers = #tpu.dot_dimension_numbers<[1], [0], [0], [1], [0, 0, 1, 1], [], []>} : vector<8x4xf32>, vector<4x16xf32>, vector<8x16xf32> -> vector<8x16xf32>
    %49 = arith.addf %44, %48 : vector<8x16xf32>
    %cst_29 = arith.constant dense<0.000000e+00> : vector<8x4xf32>
    %50 = tpu.matmul %24, %45, %cst_29 {dimension_numbers = #tpu.dot_dimension_numbers<[1], [0], [0], [1], [0, 0, 1, 1], [], []>} : vector<8x8xf32>, vector<8x4xf32>, vector<8x4xf32> -> vector<8x4xf32>
    %cst_30 = arith.constant 2.000000e+00 : f32
    %51 = vector.broadcast %cst_30 : f32 to vector<8x4xf32>
    %52 = arith.mulf %51, %50 : vector<8x4xf32>
    %53 = arith.subf %52, %1 : vector<8x4xf32>
    %c2 = arith.constant 2 : index
    %c0_31 = arith.constant 0 : index
    %c0_32 = arith.constant 0 : index
    %54 = vector.load %arg6[%c2, %c0_31, %c0_32] : memref<3x4x16xf32, #tpu.memory_space<vmem>>, vector<1x4x16xf32>
    %55 = vector.shape_cast %54 : vector<1x4x16xf32> to vector<4x16xf32>
    %cst_33 = arith.constant dense<0.000000e+00> : vector<8x16xf32>
    %56 = tpu.matmul %53, %55, %cst_33 {dimension_numbers = #tpu.dot_dimension_numbers<[1], [0], [0], [1], [0, 0, 1, 1], [], []>} : vector<8x4xf32>, vector<4x16xf32>, vector<8x16xf32> -> vector<8x16xf32>
    %57 = arith.addf %49, %56 : vector<8x16xf32>
    %c0_34 = arith.constant 0 : index
    %c0_35 = arith.constant 0 : index
    %c0_36 = arith.constant 0 : index
    %58 = vector.load %arg7[%c0_34, %c0_35, %c0_36] : memref<3x16x16xf32, #tpu.memory_space<vmem>>, vector<1x16x16xf32>
    %59 = vector.shape_cast %58 : vector<1x16x16xf32> to vector<16x16xf32>
    %cst_37 = arith.constant dense<0.000000e+00> : vector<8x16xf32>
    %60 = tpu.matmul %4, %59, %cst_37 {dimension_numbers = #tpu.dot_dimension_numbers<[1], [0], [0], [1], [0, 0, 1, 1], [], []>} : vector<8x16xf32>, vector<16x16xf32>, vector<8x16xf32> -> vector<8x16xf32>
    %61 = arith.addf %57, %60 : vector<8x16xf32>
    %cst_38 = arith.constant dense<0.000000e+00> : vector<8x16xf32>
    %62 = tpu.matmul %24, %4, %cst_38 {dimension_numbers = #tpu.dot_dimension_numbers<[1], [0], [0], [1], [0, 0, 1, 1], [], []>} : vector<8x8xf32>, vector<8x16xf32>, vector<8x16xf32> -> vector<8x16xf32>
    %c1_39 = arith.constant 1 : index
    %c0_40 = arith.constant 0 : index
    %c0_41 = arith.constant 0 : index
    %63 = vector.load %arg7[%c1_39, %c0_40, %c0_41] : memref<3x16x16xf32, #tpu.memory_space<vmem>>, vector<1x16x16xf32>
    %64 = vector.shape_cast %63 : vector<1x16x16xf32> to vector<16x16xf32>
    %cst_42 = arith.constant dense<0.000000e+00> : vector<8x16xf32>
    %65 = tpu.matmul %62, %64, %cst_42 {dimension_numbers = #tpu.dot_dimension_numbers<[1], [0], [0], [1], [0, 0, 1, 1], [], []>} : vector<8x16xf32>, vector<16x16xf32>, vector<8x16xf32> -> vector<8x16xf32>
    %66 = arith.addf %61, %65 : vector<8x16xf32>
    %cst_43 = arith.constant dense<0.000000e+00> : vector<8x16xf32>
    %67 = tpu.matmul %24, %62, %cst_43 {dimension_numbers = #tpu.dot_dimension_numbers<[1], [0], [0], [1], [0, 0, 1, 1], [], []>} : vector<8x8xf32>, vector<8x16xf32>, vector<8x16xf32> -> vector<8x16xf32>
    %cst_44 = arith.constant 2.000000e+00 : f32
    %68 = vector.broadcast %cst_44 : f32 to vector<8x16xf32>
    %69 = arith.mulf %68, %67 : vector<8x16xf32>
    %70 = arith.subf %69, %4 : vector<8x16xf32>
    %c2_45 = arith.constant 2 : index
    %c0_46 = arith.constant 0 : index
    %c0_47 = arith.constant 0 : index
    %71 = vector.load %arg7[%c2_45, %c0_46, %c0_47] : memref<3x16x16xf32, #tpu.memory_space<vmem>>, vector<1x16x16xf32>
    %72 = vector.shape_cast %71 : vector<1x16x16xf32> to vector<16x16xf32>
    %cst_48 = arith.constant dense<0.000000e+00> : vector<8x16xf32>
    %73 = tpu.matmul %70, %72, %cst_48 {dimension_numbers = #tpu.dot_dimension_numbers<[1], [0], [0], [1], [0, 0, 1, 1], [], []>} : vector<8x16xf32>, vector<16x16xf32>, vector<8x16xf32> -> vector<8x16xf32>
    %74 = arith.addf %66, %73 : vector<8x16xf32>
    %c0_49 = arith.constant 0 : index
    %c0_50 = arith.constant 0 : index
    %75 = vector.load %arg8[%c0_49, %c0_50] : memref<1x16xf32, #tpu.memory_space<vmem>>, vector<1x16xf32>
    %76 = vector.broadcast %75 : vector<1x16xf32> to vector<8x16xf32>
    %77 = arith.addf %74, %76 : vector<8x16xf32>
    %cst_51 = arith.constant 0.000000e+00 : f32
    %78 = vector.broadcast %cst_51 : f32 to vector<8x16xf32>
    %79 = arith.subf %78, %77 : vector<8x16xf32>
    %80 = math.exp %79 : vector<8x16xf32>
    %cst_52 = arith.constant 1.000000e+00 : f32
    %81 = vector.broadcast %cst_52 : f32 to vector<8x16xf32>
    %82 = arith.addf %81, %80 : vector<8x16xf32>
    %cst_53 = arith.constant 1.000000e+00 : f32
    %83 = vector.broadcast %cst_53 : f32 to vector<8x16xf32>
    %84 = arith.divf %83, %82 : vector<8x16xf32>
    %85 = vector.extract_strided_slice %84 {offsets = [0, 0], sizes = [8, 8], strides = [1, 1]} : vector<8x16xf32> to vector<8x8xf32>
    %86 = vector.extract_strided_slice %84 {offsets = [0, 8], sizes = [8, 8], strides = [1, 1]} : vector<8x16xf32> to vector<8x8xf32>
    %87 = arith.mulf %85, %3 : vector<8x8xf32>
    %cst_54 = arith.constant 0.000000e+00 : f32
    %88 = vector.broadcast %cst_54 : f32 to vector<8x8xf32>
    %c0_55 = arith.constant 0 : index
    %c0_56 = arith.constant 0 : index
    %c0_57 = arith.constant 0 : index
    %89 = vector.load %arg9[%c0_55, %c0_56, %c0_57] : memref<3x4x8xf32, #tpu.memory_space<vmem>>, vector<1x4x8xf32>
    %90 = vector.shape_cast %89 : vector<1x4x8xf32> to vector<4x8xf32>
    %cst_58 = arith.constant dense<0.000000e+00> : vector<8x8xf32>
    %91 = tpu.matmul %1, %90, %cst_58 {dimension_numbers = #tpu.dot_dimension_numbers<[1], [0], [0], [1], [0, 0, 1, 1], [], []>} : vector<8x4xf32>, vector<4x8xf32>, vector<8x8xf32> -> vector<8x8xf32>
    %92 = arith.addf %88, %91 : vector<8x8xf32>
    %cst_59 = arith.constant dense<0.000000e+00> : vector<8x4xf32>
    %93 = tpu.matmul %39, %1, %cst_59 {dimension_numbers = #tpu.dot_dimension_numbers<[1], [0], [0], [1], [0, 0, 1, 1], [], []>} : vector<8x8xf32>, vector<8x4xf32>, vector<8x4xf32> -> vector<8x4xf32>
    %c1_60 = arith.constant 1 : index
    %c0_61 = arith.constant 0 : index
    %c0_62 = arith.constant 0 : index
    %94 = vector.load %arg9[%c1_60, %c0_61, %c0_62] : memref<3x4x8xf32, #tpu.memory_space<vmem>>, vector<1x4x8xf32>
    %95 = vector.shape_cast %94 : vector<1x4x8xf32> to vector<4x8xf32>
    %cst_63 = arith.constant dense<0.000000e+00> : vector<8x8xf32>
    %96 = tpu.matmul %93, %95, %cst_63 {dimension_numbers = #tpu.dot_dimension_numbers<[1], [0], [0], [1], [0, 0, 1, 1], [], []>} : vector<8x4xf32>, vector<4x8xf32>, vector<8x8xf32> -> vector<8x8xf32>
    %97 = arith.addf %92, %96 : vector<8x8xf32>
    %cst_64 = arith.constant dense<0.000000e+00> : vector<8x4xf32>
    %98 = tpu.matmul %39, %93, %cst_64 {dimension_numbers = #tpu.dot_dimension_numbers<[1], [0], [0], [1], [0, 0, 1, 1], [], []>} : vector<8x8xf32>, vector<8x4xf32>, vector<8x4xf32> -> vector<8x4xf32>
    %cst_65 = arith.constant 2.000000e+00 : f32
    %99 = vector.broadcast %cst_65 : f32 to vector<8x4xf32>
    %100 = arith.mulf %99, %98 : vector<8x4xf32>
    %101 = arith.subf %100, %1 : vector<8x4xf32>
    %c2_66 = arith.constant 2 : index
    %c0_67 = arith.constant 0 : index
    %c0_68 = arith.constant 0 : index
    %102 = vector.load %arg9[%c2_66, %c0_67, %c0_68] : memref<3x4x8xf32, #tpu.memory_space<vmem>>, vector<1x4x8xf32>
    %103 = vector.shape_cast %102 : vector<1x4x8xf32> to vector<4x8xf32>
    %cst_69 = arith.constant dense<0.000000e+00> : vector<8x8xf32>
    %104 = tpu.matmul %101, %103, %cst_69 {dimension_numbers = #tpu.dot_dimension_numbers<[1], [0], [0], [1], [0, 0, 1, 1], [], []>} : vector<8x4xf32>, vector<4x8xf32>, vector<8x8xf32> -> vector<8x8xf32>
    %105 = arith.addf %97, %104 : vector<8x8xf32>
    %c0_70 = arith.constant 0 : index
    %c0_71 = arith.constant 0 : index
    %c0_72 = arith.constant 0 : index
    %106 = vector.load %arg10[%c0_70, %c0_71, %c0_72] : memref<3x8x8xf32, #tpu.memory_space<vmem>>, vector<1x8x8xf32>
    %107 = vector.shape_cast %106 : vector<1x8x8xf32> to vector<8x8xf32>
    %cst_73 = arith.constant dense<0.000000e+00> : vector<8x8xf32>
    %108 = tpu.matmul %87, %107, %cst_73 {dimension_numbers = #tpu.dot_dimension_numbers<[1], [0], [0], [1], [0, 0, 1, 1], [], []>} : vector<8x8xf32>, vector<8x8xf32>, vector<8x8xf32> -> vector<8x8xf32>
    %109 = arith.addf %105, %108 : vector<8x8xf32>
    %cst_74 = arith.constant dense<0.000000e+00> : vector<8x8xf32>
    %110 = tpu.matmul %39, %87, %cst_74 {dimension_numbers = #tpu.dot_dimension_numbers<[1], [0], [0], [1], [0, 0, 1, 1], [], []>} : vector<8x8xf32>, vector<8x8xf32>, vector<8x8xf32> -> vector<8x8xf32>
    %c1_75 = arith.constant 1 : index
    %c0_76 = arith.constant 0 : index
    %c0_77 = arith.constant 0 : index
    %111 = vector.load %arg10[%c1_75, %c0_76, %c0_77] : memref<3x8x8xf32, #tpu.memory_space<vmem>>, vector<1x8x8xf32>
    %112 = vector.shape_cast %111 : vector<1x8x8xf32> to vector<8x8xf32>
    %cst_78 = arith.constant dense<0.000000e+00> : vector<8x8xf32>
    %113 = tpu.matmul %110, %112, %cst_78 {dimension_numbers = #tpu.dot_dimension_numbers<[1], [0], [0], [1], [0, 0, 1, 1], [], []>} : vector<8x8xf32>, vector<8x8xf32>, vector<8x8xf32> -> vector<8x8xf32>
    %114 = arith.addf %109, %113 : vector<8x8xf32>
    %cst_79 = arith.constant dense<0.000000e+00> : vector<8x8xf32>
    %115 = tpu.matmul %39, %110, %cst_79 {dimension_numbers = #tpu.dot_dimension_numbers<[1], [0], [0], [1], [0, 0, 1, 1], [], []>} : vector<8x8xf32>, vector<8x8xf32>, vector<8x8xf32> -> vector<8x8xf32>
    %cst_80 = arith.constant 2.000000e+00 : f32
    %116 = vector.broadcast %cst_80 : f32 to vector<8x8xf32>
    %117 = arith.mulf %116, %115 : vector<8x8xf32>
    %118 = arith.subf %117, %87 : vector<8x8xf32>
    %c2_81 = arith.constant 2 : index
    %c0_82 = arith.constant 0 : index
    %c0_83 = arith.constant 0 : index
    %119 = vector.load %arg10[%c2_81, %c0_82, %c0_83] : memref<3x8x8xf32, #tpu.memory_space<vmem>>, vector<1x8x8xf32>
    %120 = vector.shape_cast %119 : vector<1x8x8xf32> to vector<8x8xf32>
    %cst_84 = arith.constant dense<0.000000e+00> : vector<8x8xf32>
    %121 = tpu.matmul %118, %120, %cst_84 {dimension_numbers = #tpu.dot_dimension_numbers<[1], [0], [0], [1], [0, 0, 1, 1], [], []>} : vector<8x8xf32>, vector<8x8xf32>, vector<8x8xf32> -> vector<8x8xf32>
    %122 = arith.addf %114, %121 : vector<8x8xf32>
    %c0_85 = arith.constant 0 : index
    %c0_86 = arith.constant 0 : index
    %123 = vector.load %arg11[%c0_85, %c0_86] : memref<1x8xf32, #tpu.memory_space<vmem>>, vector<1x8xf32>
    %124 = vector.broadcast %123 : vector<1x8xf32> to vector<8x8xf32>
    %125 = arith.addf %122, %124 : vector<8x8xf32>
    %126 = math.tanh %125 : vector<8x8xf32>
    %127 = arith.mulf %86, %3 : vector<8x8xf32>
    %cst_87 = arith.constant 1.000000e+00 : f32
    %128 = vector.broadcast %cst_87 : f32 to vector<8x8xf32>
    %129 = arith.subf %128, %86 : vector<8x8xf32>
    %130 = arith.mulf %129, %126 : vector<8x8xf32>
    %131 = arith.addf %127, %130 : vector<8x8xf32>
    %c0_88 = arith.constant 0 : index
    %c0_89 = arith.constant 0 : index
    %c0_90 = arith.constant 0 : index
    %132 = vector.load %arg12[%c0_88, %c0_89, %c0_90] : memref<1x8x8xf32, #tpu.memory_space<vmem>>, vector<1x8x8xf32>
    %133 = vector.shape_cast %132 : vector<1x8x8xf32> to vector<8x8xf32>
    %134 = vector.shape_cast %131 : vector<8x8xf32> to vector<1x8x8xf32>
    tpu.vector_store %arg12[%c0_88, %c0_89, %c0_90], %134 {strides = array<i32>} : memref<1x8x8xf32, #tpu.memory_space<vmem>>, vector<1x8x8xf32>,
    return
  }
  func.func @transform_0(%arg0: i32) -> (i32, i32, i32) {
    %c0_i32 = arith.constant 0 : i32
    %c0_i32_0 = arith.constant 0 : i32
    %c0_i32_1 = arith.constant 0 : i32
    return %arg0, %c0_i32, %c0_i32_0 : i32, i32, i32
  }
  func.func @transform_1(%arg0: i32) -> (i32, i32, i32) {
    %c0_i32 = arith.constant 0 : i32
    %c0_i32_0 = arith.constant 0 : i32
    %c0_i32_1 = arith.constant 0 : i32
    return %arg0, %c0_i32, %c0_i32_0 : i32, i32, i32
  }
  func.func @transform_2(%arg0: i32) -> (i32, i32) {
    %c0_i32 = arith.constant 0 : i32
    %c0_i32_0 = arith.constant 0 : i32
    %c0_i32_1 = arith.constant 0 : i32
    return %c0_i32, %c0_i32_0 : i32, i32
  }
  func.func @transform_3(%arg0: i32) -> (i32, i32, i32) {
    %c0_i32 = arith.constant 0 : i32
    %c0_i32_0 = arith.constant 0 : i32
    %c0_i32_1 = arith.constant 0 : i32
    return %arg0, %c0_i32, %c0_i32_0 : i32, i32, i32
  }
  func.func @transform_4(%arg0: i32) -> (i32, i32, i32) {
    %c1_i32 = arith.constant 1 : i32
    %c0_i32 = arith.constant 0 : i32
    %c0_i32_0 = arith.constant 0 : i32
    %c0_i32_1 = arith.constant 0 : i32
    return %c1_i32, %c0_i32, %c0_i32_0 : i32, i32, i32
  }
  func.func @transform_5(%arg0: i32) -> (i32, i32, i32) {
    %c0_i32 = arith.constant 0 : i32
    %c0_i32_0 = arith.constant 0 : i32
    %c0_i32_1 = arith.constant 0 : i32
    %c0_i32_2 = arith.constant 0 : i32
    return %c0_i32, %c0_i32_0, %c0_i32_1 : i32, i32, i32
  }
  func.func @transform_6(%arg0: i32) -> (i32, i32, i32) {
    %c0_i32 = arith.constant 0 : i32
    %c0_i32_0 = arith.constant 0 : i32
    %c0_i32_1 = arith.constant 0 : i32
    %c0_i32_2 = arith.constant 0 : i32
    return %c0_i32, %c0_i32_0, %c0_i32_1 : i32, i32, i32
  }
  func.func @transform_7(%arg0: i32) -> (i32, i32) {
    %c0_i32 = arith.constant 0 : i32
    %c0_i32_0 = arith.constant 0 : i32
    %c0_i32_1 = arith.constant 0 : i32
    return %c0_i32, %c0_i32_0 : i32, i32
  }
  func.func @transform_8(%arg0: i32) -> (i32, i32, i32) {
    %c0_i32 = arith.constant 0 : i32
    %c0_i32_0 = arith.constant 0 : i32
    %c0_i32_1 = arith.constant 0 : i32
    %c0_i32_2 = arith.constant 0 : i32
    return %c0_i32, %c0_i32_0, %c0_i32_1 : i32, i32, i32
  }
  func.func @transform_9(%arg0: i32) -> (i32, i32, i32) {
    %c0_i32 = arith.constant 0 : i32
    %c0_i32_0 = arith.constant 0 : i32
    %c0_i32_1 = arith.constant 0 : i32
    %c0_i32_2 = arith.constant 0 : i32
    return %c0_i32, %c0_i32_0, %c0_i32_1 : i32, i32, i32
  }
  func.func @transform_10(%arg0: i32) -> (i32, i32) {
    %c0_i32 = arith.constant 0 : i32
    %c0_i32_0 = arith.constant 0 : i32
    %c0_i32_1 = arith.constant 0 : i32
    return %c0_i32, %c0_i32_0 : i32, i32
  }
  func.func @transform_11(%arg0: i32) -> (i32, i32, i32) {
    %c0_i32 = arith.constant 0 : i32
    %c0_i32_0 = arith.constant 0 : i32
    %c0_i32_1 = arith.constant 0 : i32
    return %arg0, %c0_i32, %c0_i32_0 : i32, i32, i32
  }
}

</mosaic_0001>

<bundles_post_ra>
// kernel: tpu_custom_call.1
= control target key start
LH: loop header
LB: loop body
LE: loop exit
PB: predicated region body
PF: predicated region fallthrough
CT: control target
= control target key end

     0   :  { %s2199_s0 = inlined_call_operand.vmem [shape: f32[2,8,4], index: 0, kind: input, shape index: {}]   ;;  %s2200_s1 = inlined_call_operand.hbm [shape: f32[2,8,8], index: 1, kind: input, shape index: {}]   ;;  %s2201_s2 = inlined_call_operand.vmem [shape: f32[8,16], index: 2, kind: input, shape index: {}]   ;;  %s2202_s3 = inlined_call_operand.hbm [shape: f32[2,8,8], index: 3, kind: input, shape index: {}]   ;;  %s2203_s4 = inlined_call_operand.hbm [shape: f32[2,8,8], index: 4, kind: input, shape index: {}]   ;;  %s2204_s5 = inlined_call_operand.hbm [shape: f32[3,4,16], index: 5, kind: input, shape index: {}]   ;;  %s2205_s6 = inlined_call_operand.hbm [shape: f32[3,16,16], index: 6, kind: input, shape index: {}]   ;;  %s2206_s7 = inlined_call_operand.hbm [shape: f32[1,16], index: 7, kind: input, shape index: {}]   ;;  %s2207_s8 = inlined_call_operand.hbm [shape: f32[3,4,8], index: 8, kind: input, shape index: {}]   ;;  %s2208_s9 = inlined_call_operand.vmem [shape: f32[3,8,8], index: 9, kind: input, shape index: {}]   ;;  %s2209_s10 = inlined_call_operand.vmem [shape: f32[1,8], index: 10, kind: input, shape index: {}]   ;;  %s2210_s11 = inlined_call_operand.hbm [shape: f32[2,8,8], index: 11, kind: output, shape index: {}]  }
   0x1   :  { %2216 = sst [smem:[#allocation26_spill]] %s2203_s4 }
   0x2   :  { %2217 = sst [smem:[#allocation27_spill]] %s2204_s5 }
   0x3   :  { %2218 = sst [smem:[#allocation28_spill]] %s2205_s6 }
   0x4   :  { %2219 = sst [smem:[#allocation29_spill]] %s2206_s7 }
   0x5   :  { %2220 = sst [smem:[#allocation30_spill]] %s2207_s8 }
   0x6   :  { %16 = vsyncpa [#allocation3], 0 }
   0x7   :  { %18 = vsyncpa [#allocation3 + $0x1], 0 }
   0x8   :  { %19 = vsyncpa [#allocation6], 0 }
   0x9   :  { %21 = vsyncpa [#allocation6 + $0x1], 0 }
   0xa   :  { %22 = vsyncpa [#allocation9], 0 }
   0xb   :  { %23 = vsyncpa [#allocation12], 0 }
   0xc   :  { %24 = vsyncpa [#allocation4], 0 }
   0xd   :  { %26 = vsyncpa [#allocation4 + $0x1], 0  ;;  %s1919_s17 = smov 0   ;;  %s1921_s18 = smov 0  }
   0xe   :  { %s1923_s19 = smov 0   ;;  %s1925_s20 = smov 0  }
   0xf LB: > { %2221 = sst [smem:[#allocation21_spill]] %s1841_s19  ;;  %s1943_s25 = sadd.s32 4294967295, %s1845_s20   ;;  %s1845_s20 = sphi %s1925_s20, %s2241_s20   ;;  %s1841_s19 = sphi %s1923_s19, %s2243_s19   ;;  %s1837_s18 = sphi %s1921_s18, %s2245_s18   ;;  %s1833_s17 = sphi %s1919_s17, %s2244_s17  }
  0x10   : > { %2222 = sst [smem:[#allocation22_spill]] %s1845_s20  ;;  %p1378_p0 = scmp.ge.s32.totalorder %s1845_s20, 1 }
  0x11   : > { %s2223_s4 = sld [smem:[#allocation26_spill]]  ;;  %p79_p1 = scmp.eq.s32.totalorder %s1943_s25, 0 }
  0x12   : > { %p309_p2 = scmp.lt.s32.totalorder %s1845_s20, 3  ;;  %s1847_s27 = smov [#allocation7]  }
  0x13   : > { %s327_s28 = sshll.u32 %s1847_s27, 4  ;;  %s2225_s5 = sld [smem:[#allocation27_spill]]  ;;  %s328_s28 = int_to_ptr.vmem [resolvable:$true] %s327_s28 }
  0x14   : > { %p1948_p3 = pnand %p1378_p0, %p309_p2  ;;  %s1848_s14 = smov [#allocation8]  }
  0x15   : > { %s338_s15 = sshll.u32 %s1848_s14, 4  ;;  %s2227_s7 = sld [smem:[#allocation29_spill]]  ;;  %s339_s15 = int_to_ptr.vmem [resolvable:$true] %s338_s15 }
  0x16   : > { %p1458_p5 = pneg %p1948_p3  ;;  %s1850_s27 = smov 4  }
  0x17   : > { %s323_s23 = scalar_lea.hbm %s2223_s4, 8  ;;  %s1851_s29 = smov [#allocation11]  }
  0x18   : > { %s325_s24 = sshll.u32 %s323_s23, 4  ;;  %p1960_p6 = pnand %p1458_p5, %p79_p1  ;;  %s326_s24 = int_to_ptr.hbm [resolvable:$true] %s325_s24 }
  0x19   : > { %s336_s12 = sshll.u32 %s2225_s5, 4  ;;  %s1849_s23 = smov 64   ;;  %s337_s12 = int_to_ptr.hbm [resolvable:$true] %s336_s12 }
  0x1a   : > { %1461 = dma.hbm_to_vmem [thread:$0]  (!%p1960_p6), %s326_s24, 128, %s328_s28, [#allocation6]  }
  0x1b   : > { %s365_s22 = sshll.u32 %s2227_s7, 4  ;;  %s367_s30 = sshll.u32 %s1851_s29, 4  ;;  %s366_s22 = int_to_ptr.hbm [resolvable:$true] %s365_s22  ;;  %s368_s30 = int_to_ptr.vmem [resolvable:$true] %s367_s30 }
  0x1c   : > { %1464 = dma.hbm_to_vmem [thread:$0]  (!%p1960_p6), %s337_s12, 192, %s339_s15, [#allocation9], %s1849_s23, %s1849_s23, %s1850_s27  }
  0x1d   : > { %s2228_s6 = sld [smem:[#allocation28_spill]]  ;;  %s1852_s24 = smov [#allocation10]  }
  0x1e   : > { %1470 = dma.hbm_to_vmem [thread:$0]  (!%p1960_p6), %s366_s22, 16, %s368_s30, [#allocation12]  }
  0x1f   : > { %s352_s28 = sshll.u32 %s1852_s24, 4  ;;  %s2229_s8 = sld [smem:[#allocation30_spill]]  ;;  %s353_s28 = int_to_ptr.vmem [resolvable:$true] %s352_s28 }
  0x20   : > { %s1853_s5 = smov 128   ;;  %s1854_s16 = smov 8  }
  0x21   : > { %s1855_s21 = smov [#allocation13]   ;;  %s1377_s29 = sadd.s32 4294967294, %s1845_s20  }
  0x22   : > { %s378_s22 = sshll.u32 %s1855_s21, 4  ;;  %s1985_s30 = sadd.s32 1, %s1845_s20   ;;  %s379_s22 = int_to_ptr.vmem [resolvable:$true] %s378_s22 }
  0x23   : > { %s350_s14 = sshll.u32 %s2228_s6, 4  ;;  %2230 = sst [smem:[#allocation23_spill]] %s1985_s30  ;;  %s351_s14 = int_to_ptr.hbm [resolvable:$true] %s350_s14 }
  0x24   : > { %1467 = dma.hbm_to_vmem [thread:$0]  (!%p1960_p6), %s351_s14, 768, %s353_s28, [#allocation9], %s1853_s5, %s1853_s5, %s1854_s16  }
  0x25   : > { %s376_s4 = sshll.u32 %s2229_s8, 4  ;;  %s62_s24 = ssub.s32 %s1845_s20, %s1985_s30  ;;  %s377_s4 = int_to_ptr.hbm [resolvable:$true] %s376_s4 }
  0x26   : > { %1473 = dma.hbm_to_vmem [thread:$0]  (!%p1960_p6), %s377_s4, 192, %s379_s22, [#allocation12], %s1849_s23, %s1849_s23, %s1850_s27  }
  0x27   : > { %s65_s12 = sadd.s32 1, %s1841_s19  ;;  %p63_p7 = scmp.eq.s32.totalorder %s62_s24, 0 }
  0x28   : > { %p72_p8 = scmp.ne.s32.totalorder %s1841_s19, %s1837_s18  ;;  %p73_p9 = scmp.eq.s32.totalorder %s1845_s20, 0 }
  0x29   : > { %p78_p10 = scmp.ne.s32.totalorder %s1837_s18, %s1833_s17  ;;  %p296_p13 = scmp.eq.s32.totalorder %s1943_s25, 1 }
  0x2a   : > { %s1996_s14 = scalar_select %p63_p7, %s1841_s19, %s65_s12  }
  0x2b   : > { %p1998_p11 = por %p73_p9, %p72_p8  ;;  %p2004_p12 = por %p79_p1, %p78_p10 }
  0x2c   : > { %2231 = sst [smem:[#allocation24_spill]] %s1996_s14  ;;  %p302_p0 = scmp.eq.s32.totalorder %s1377_s29, 1 }
  0x2d   : > { %p1490_p2 = scmp.lt.s32.totalorder %s1845_s20, 2  ;;  %s405_s23 = sand.u32 1, %s1841_s19  }
  0x2e   : > { %p2011_p5 = por %p296_p13, %p72_p8  ;;  %p2015_p6 = por %p302_p0, %p78_p10 }
  0x2f   : > { %s2019_s4 = sshll.u32 %s405_s23, 3  ;;  %s1386_s5 = sshll.u32 %s1845_s20, 3 }
  0x30   : > { %s2235_s15 = scalar_select %p2015_p6, 1, 0 }
  0x31   : > { %s413_s22 = scalar_lea.hbm %s2200_s1, %s1386_s5  ;;  %s409_s24 = scalar_lea.vmem [#allocation2], %s2019_s4 }
  0x32   : > { %2236 = sst [smem:[#allocation25_spill]] %s2235_s15  ;;  %s417_s29 = sshll.u32 %s409_s24, 4  ;;  %s418_s29 = int_to_ptr.vmem [resolvable:$true] %s417_s29 }
  0x33   : > { %s415_s12 = sshll.u32 %s413_s22, 4  ;;  %p2028_p7 = pnand %p1490_p2, %p1998_p11  ;;  %s416_s12 = int_to_ptr.hbm [resolvable:$true] %s415_s12 }
  0x34   : > { %s432_s14 = scalar_lea.hbm %s2202_s3, %s1386_s5  ;;  %s424_s19 = sand.u32 1, %s1845_s20  }
  0x35   : > { %s406_s30 = scalar_lea.sflag [#allocation3], %s405_s23  ;;  %s1703_s16 = sshra.s32 %s416_s12, 4  ;;  %s1704_s16 = int_to_ptr.hbm [resolvable:$true] %s1703_s16 }
  0x36   : > { %s1705_s21 = scalar_lea.hbm %s1704_s16, 8  ;;  %p1707_p9 = pneg %p2028_p7 }
  0x37   : > { %p1706_p8 = scmp.ne.s32.totalorder %s1704_s16, %s1705_s21  ;;  %s1710_s24 = scalar_lea.hbm %s2200_s1, 16 }
  0x38   : > { %p1711_p13 = scmp.lt.s32.totalorder %s1704_s16, %s2200_s1  ;;  %p1712_p0 = scmp.lt.s32.totalorder %s1710_s24, %s1705_s21 }
  0x39   : > { %p1708_p10 = pnand %p1707_p9, %p1706_p8 }
  0x3a   : > { %p1713_p2 = por %p1712_p0, %p1711_p13 }
  0x3b   : > { %p1709_p11 = pneg %p1708_p10 }
  0x3d   : > { %p1714_p4 = pnand %p1713_p2, %p1709_p11 }
  0x3f   : > { %1717 = shalt.err (!%p1714_p4)
}
  0x40   : > { %1477 = dma.hbm_to_vmem [thread:$0]  (!%p2028_p7), %s416_s12, 128, %s418_s29, %s406_s30  }
  0x41   : > { %s434_s23 = sshll.u32 %s432_s14, 4  ;;  %s428_s5 = scalar_lea.vmem [#allocation5], %s2019_s4  ;;  %s435_s23 = int_to_ptr.hbm [resolvable:$true] %s434_s23 }
  0x42   : > { %s436_s20 = sshll.u32 %s428_s5, 4  ;;  %s425_s28 = scalar_lea.sflag [#allocation6], %s424_s19  ;;  %s437_s20 = int_to_ptr.vmem [resolvable:$true] %s436_s20 }
  0x43   : > { %s1733_s22 = sshra.s32 %s435_s23, 4  ;;  %s1740_s24 = scalar_lea.hbm %s2202_s3, 16  ;;  %s1734_s22 = int_to_ptr.hbm [resolvable:$true] %s1733_s22 }
  0x44   : > { %s1735_s15 = scalar_lea.hbm %s1734_s22, 8  ;;  %p1741_p4 = scmp.lt.s32.totalorder %s1734_s22, %s2202_s3 }
  0x45   : > { %p1736_p8 = scmp.ne.s32.totalorder %s1734_s22, %s1735_s15  ;;  %p1742_p13 = scmp.lt.s32.totalorder %s1740_s24, %s1735_s15 }
  0x47   : > { %p1738_p10 = pnand %p1736_p8, %p1707_p9  ;;  %p1743_p0 = por %p1742_p13, %p1741_p4 }
  0x49   : > { %p1739_p11 = pneg %p1738_p10 }
  0x4b   : > { %p1744_p2 = pnand %p1743_p0, %p1739_p11 }
  0x4d   : > { %1747 = shalt.err (!%p1744_p2)
}
  0x4e   : > { %1480 = dma.hbm_to_vmem [thread:$0]  (!%p2028_p7), %s435_s23, 128, %s437_s20, %s425_s28  }
  0x4f   : > { %445 = sbr.rel (%p1948_p3) target bundleno = 1566 (0x61e), region = 64  ;;  %s2064_s19 = sand.u32 (!%p1948_p3), 1, %s1837_s18  }
  0x50   : > { %s2067_s14 = sshll.u32 (!%p1948_p3), %s2064_s19, 3  ;;  %s448_s4 = scalar_lea.sflag (!%p1948_p3), [#allocation3], %s2064_s19 }
  0x51   : > { %s451_s15 = scalar_lea.vmem (!%p1948_p3), [#allocation2], %s2067_s14 }
  0x54   : > { %1808 = dma.done.wait (%p2004_p12), %s448_s4, 128  }
  0x55   : > { %1810 = vsyncadd (%p2004_p12), %s448_s4, 4294967168  ;;  %s457_s6 = sand.u32 1, %s1943_s25   ;;  %s461_s26 = scalar_lea.vmem [#allocation5], %s2067_s14 }
  0x56   : > { %s458_s20 = scalar_lea.sflag [#allocation6], %s457_s6 }
  0x57   : > { %1812 = dma.done.wait (%p2004_p12), %s458_s20, 128  }
  0x58   : > { %1814 = vsyncadd (%p2004_p12), %s458_s20, 4294967168 }
  0x59   : > { %1816 = dma.done.wait (%p79_p1), [#allocation6], 128  }
  0x5a   : > { %1818 = vsyncadd (%p79_p1), [#allocation6], 4294967168 }
  0x5b   : > { %1820 = dma.done.wait (%p79_p1), [#allocation9], 960  }
  0x5c   : > { %1822 = vsyncadd (%p79_p1), [#allocation9], 4294966336 }
  0x5d   : > { %1824 = dma.done.wait (%p79_p1), [#allocation12], 208  }
  0x5e   : > { %1826 = vsyncadd (%p79_p1), [#allocation12], 4294967088  ;;  %v542_v0 = vlaneseq  ;;  %v1856_v3 = vmov 0.0   ;;  %v549_v5 = vld [vmem:[%s461_s26] sm:$0xff]  ;;  %vm551_vm1 = vcmask 64512   ;;  %p535_p3 = scmp.lt.s32.totalorder %s1943_s25, 1 }
  0x5f   : > { %v606_v8 = vld [vmem:[#allocation7] sm:$0xff]  ;;  %v662_v9 = vld [vmem:[#allocation8] sm:$0xf]  ;;  %vm692_vm2 = vcmask 1043456   ;;  %vm688_vm3 = vcmask 31744   ;;  %v842_v47 = vld [vmem:[#allocation10 + $0x18] sm:$0xff] }
  0x60   : > { %v543_v1 = vshrl.u32 %v542_v0, 7  ;;  %v545_v2 = vand.u32 127, %v542_v0  ;;  %s536_s13 = scalar_select %p535_p3, %s1943_s25, 1  ;;  %1403 = vmatpush.msk.msra.mxu2 %vm692_vm2, %v662_v9  ;;  %v2109_v27 = vld [vmem:[%s2201_s2] sm:$0xff]  ;;  %v687_v43 = vld [vmem:[#allocation8 + $0x4] sm:$0xf] }
  0x61   : > { %1401 = vmatpush.msk.msra.mxu1 %vm692_vm2, %v687_v43  ;;  %v765_v44 = vld [vmem:[#allocation8 + $0x8] sm:$0xf]  ;;  %v841_v48 = vld [vmem:[#allocation10 + $0x10] sm:$0xff]  ;;  %vm795_vm14 = vcmask 130048   ;;  %v794_v50 = vld [vmem:[#allocation10 + $0x8] sm:$0xff]  ;;  %s1857_s22 = smov 8  }
  0x62   : > { %vm546_vm0 = vcmp.eq.s32.totalorder %v543_v1, %v545_v2  ;;  %s1398_s29 = sshll.u32 %s536_s13, 3  ;;  %835 = vmatpush.msrb.mxu2 %v2109_v27  ;;  %v793_v51 = vld [vmem:[#allocation10] sm:$0xff]  ;;  %v891_v56 = vld [vmem:[#allocation10 + $0x28] sm:$0xff]  ;;  %v966_v1 = vld [vmem:[#allocation13 + $0x4] sm:$0xf]  ;;  %s1858_s20 = smov 120  }
  0x63   : > { %v1399_v4 = vsel %vm546_vm0, 1.0, %v1856_v3  ;;  %s538_s23 = scalar_lea.vmem %s2199_s0, %s1398_s29  ;;  %813 = vmatpush.msrb.mxu1 %v794_v50  ;;  %v890_v57 = vld [vmem:[#allocation10 + $0x20] sm:$0xff]  ;;  %v540_v59 = vld [vmem:[%s451_s15] sm:$0xff]  ;;  %s1429_s26 = sshll.u32 %s1943_s25, 3 }
  0x64   : > { %v550_v6 = vadd.f32 %v1399_v4, %v549_v5  ;;  %v2099_v10 = vld [vmem:[%s538_s23] sm:$0xff]  ;;  %v607_v11 = vadd.f32 %v1399_v4, %v606_v8  ;;  %1193 = vrot.lane.b32.xlu2 %v540_v59, %s1857_s22  ;;  %v1039_v2 = vld [vmem:[#allocation13 + $0x8] sm:$0xf]  ;;  %s1220_s12 = scalar_lea.hbm %s2210_s11, %s1429_s26  ;;  %s534_s8 = scalar_lea.vmem [#allocation14], %s2067_s14 }
  0x65   : > { %681 = vmatpush.msra.mxu0 %v2099_v10  ;;  %1404 = vmatmul.msk.f32.vlgmr.msra.gmra.mxu2 %vm688_vm3, %v2099_v10  ;;  %v941_v3 = vld [vmem:[#allocation13] sm:$0xf]  ;;  %s1222_s23 = sshll.u32 %s534_s8, 4  ;;  %s1224_s5 = sshll.u32 %s1220_s12, 4  ;;  %s1223_s23 = int_to_ptr.vmem [resolvable:$true] %s1222_s23  ;;  %s1225_s5 = int_to_ptr.hbm [resolvable:$true] %s1224_s5 }
  0x66   : > { %v552_v7 = vsel %vm551_vm1, %v550_v6, 0.0  ;;  %v608_v12 = vsel %vm551_vm1, %v607_v11, 0.0  ;;  %960 = vmatpush.msra.mxu2 %v2099_v10  ;;  %814 = vmatpush.msrb.mxu1 %v793_v51  ;;  %s1210_s28 = scalar_lea.sflag [#allocation4], %s2064_s19  ;;  %s1783_s24 = scalar_lea.hbm %s2210_s11, 16 }
  0x67   : > { %553 = vadd.xlane.f32.xlu0 %v552_v7  ;;  %609 = vadd.xlane.f32.xlu1 %v608_v12 }
  0x68   : > { %1406 = vmatpush.msk.msrb.mxu0 %vm692_vm2, %v765_v44 }
  0xda   : > { %v554_v13 = vpop.xlane.xlu0 %553  ;;  %v610_v28 = vpop.xlane.xlu1 %609 }
  0xdb   : > { %1543 = vrcp.f32 %v554_v13  ;;  %v566_v17 = vand.u32 2147483648, %v554_v13  ;;  %v564_v19 = vand.u32 2147483647, %v554_v13  ;;  %vm560_vm5 = vweird.f32 %v554_v13 }
  0xdc   : > { %1545 = vrcp.f32 %v610_v28  ;;  %v622_v31 = vand.u32 2147483648, %v610_v28  ;;  %vm616_vm9 = vweird.f32 %v610_v28  ;;  %v620_v33 = vand.u32 2147483647, %v610_v28 }
  0xdd   : > { %v567_v21 = vor.u32 1.1754944e-38, %v566_v17  ;;  %vm565_vm7 = vcmp.eq.f32.partialorder %v564_v19, 8.507059e+37 }
  0xde   : > { %v623_v35 = vor.u32 1.1754944e-38, %v622_v31  ;;  %vm621_vm12 = vcmp.eq.f32.partialorder %v620_v33, 8.507059e+37  ;;  %v1423_v33 = vld [vmem:[%s2208_s9 + $0x8] sm:$0xff] }
  0xe1   : > { %v1544_v14 = vpop.eup %1543 }
  0xe2   : > { %v556_v15 = vmul.f32 %v1544_v14, %v554_v13  ;;  %vm561_vm4 = vweird.f32 %v1544_v14  ;;  %v1546_v29 = vpop.eup %1545 }
  0xe3   : > { %vm562_vm6 = vmor %vm560_vm5, %vm561_vm4  ;;  %v612_v30 = vmul.f32 %v1546_v29, %v610_v28  ;;  %vm617_vm10 = vweird.f32 %v1546_v29 }
  0xe4   : > { %v557_v16 = vsub.f32 1.0, %v556_v15  ;;  %vm618_vm11 = vmor %vm616_vm9, %vm617_vm10  ;;  %v1067_v15 = vld [vmem:[%s2208_s9] sm:$0xff] }
  0xe5   : > { %v613_v32 = vsub.f32 1.0, %v612_v30 }
  0xe6   : > { %v558_v18 = vmul.f32 %v1544_v14, %v557_v16 }
  0xe7   : > { %v614_v34 = vmul.f32 %v1546_v29, %v613_v32 }
  0xe8   : > { %v559_v20 = vadd.f32 %v1544_v14, %v558_v18  ;;  %v739_v45 = vpop.f32.mrf.mxu2 }
  0xe9   : > { %v615_v36 = vadd.f32 %v1546_v29, %v614_v34 }
  0xea   : > { %v563_v22 = vsel %vm562_vm6, %v1544_v14, %v559_v20 }
  0xeb   : > { %v568_v23 = vsel %vm565_vm7, %v567_v21, %v563_v22  ;;  %v619_v37 = vsel %vm618_vm11, %v1546_v29, %v615_v36  ;;  %v1426_v36 = vld [vmem:[%s2208_s9 + $0x10] sm:$0xff] }
  0xec   : > { %v570_v24 = vand.u32 2147483647, %v568_v23  ;;  %v624_v38 = vsel %vm621_vm12, %v623_v35, %v619_v37 }
  0xed   : > { %v626_v39 = vand.u32 2147483647, %v624_v38 }
  0xee   : > { %vm571_vm8 = vcmp.eq.f32.partialorder %v570_v24, inf }
  0xef   : > { %v572_v25 = vsel %vm571_vm8, 0.0, %v568_v23  ;;  %vm627_vm13 = vcmp.eq.f32.partialorder %v626_v39, inf }
  0xf0   : > { %v573_v26 = vmul.f32 %v572_v25, %v550_v6  ;;  %v628_v40 = vsel %vm627_vm13, 0.0, %v624_v38 }
  0xf1   : > { %v629_v41 = vmul.f32 %v628_v40, %v607_v11  ;;  %v1541_v11 = vld [vmem:[#allocation11] ss:$0 sm:$0xff] }
  0xf2   : > { %574 = vxpose.xlu0.b32.start.end [1/1] (short) (narrow) %v573_v26, 8 }
  0xf3   : > { %630 = vxpose.xlu1.b32.start.end [1/1] (short) (narrow) %v629_v41, 8 }
 0x196   : > { %v590_v42 = vpop.trf.xlu0 }
 0x197   : > { %1400 = vmatmul.msk.f32.vlgmr.msra.gmra.mxu0 %vm551_vm1, %v590_v42  ;;  %1409 = vmatmul.msk.f32.vlgmr.msrb.gmra.mxu2 %vm551_vm1, %v590_v42  ;;  %v2122_v52 = vpop.trf.xlu1 }
 0x198   : > { %1419 = vmatpush.msk.msrb.mxu2 %vm692_vm2, %v1039_v2 }
 0x19f   : > { %1413 = vmatmul.msk.f32.vlgmr.msra.gmra.mxu2 %vm551_vm1, %v2122_v52 }
 0x214   : > { %v683_v46 = vpop.f32.mrf.mxu0 }
 0x215   : > { %1402 = vmatmul.msk.f32.vlgmr.msra.gmra.mxu1 %vm688_vm3, %v683_v46  ;;  %757 = vmatpush.msra.mxu3 %v683_v46 }
 0x216   : > { %1405 = vmatmul.msk.f32.vlgmr.msra.gmra.mxu3 %vm551_vm1, %v590_v42  ;;  %909 = vmatpush.msra.mxu1 %v891_v56 }
 0x217   : > { %860 = vmatpush.msrb.mxu3 %v842_v47 }
 0x218   : > { %910 = vmatpush.msra.mxu1 %v890_v57 }
 0x219   : > { %861 = vmatpush.msrb.mxu3 %v841_v48  ;;  %v1542_v48 = vld [vmem:[%s2209_s10] ss:$0 sm:$0xff] }
 0x21a   : > { %v837_v49 = vpop.f32.mrf.mxu2 }
 0x21b   : > { %882 = vmatpush.msra.mxu0 %v837_v49  ;;  %1414 = vmatpush.msk.msra.mxu3 %vm692_vm2, %v966_v1 }
 0x21d   : > { %1408 = vmatmul.msk.f32.vlgmr.msrb.gmra.mxu1 %vm795_vm14, %v2109_v27 }
 0x21e   : > { %1410 = vmatmul.msk.f32.vlgmr.msrb.gmra.mxu3 %vm795_vm14, %v837_v49 }
 0x21f   : > { %1086 = vmatpush.msrb.mxu3 %v1067_v15 }
 0x222   : > { %v962_v58 = vpop.f32.mrf.mxu2 }
 0x223   : > { %1031 = vmatpush.msrb.mxu1 %v962_v58 }
 0x226   : > { %1415 = vmatmul.msk.f32.vlgmr.msra.gmra.mxu3 %vm688_vm3, %v962_v58 }
 0x227   : > { %1180 = vmatpush.msra.mxu3 %v1426_v36 }
 0x292   : > { %v713_v0 = vpop.f32.mrf.mxu1 }
 0x293   : > { %v740_v4 = vadd.f32 %v739_v45, %v713_v0 }
 0x299   : > { %v759_v53 = vpop.f32.mrf.mxu3 }
 0x29a   : > { %v762_v54 = vmul.f32 2.0, %v759_v53  ;;  %v816_v6 = vpop.f32.mrf.mxu1  ;;  %v1194_v53 = vpop.permute.xlu2 %1193 }
 0x29c   : > { %v763_v55 = vsub.f32 %v762_v54, %v2099_v10 }
 0x29e   : > { %1407 = vmatmul.msk.f32.vlgmr.msrb.gmra.mxu0 %vm688_vm3, %v763_v55 }
 0x29f   : > { %1416 = vmatpush.msk.msrb.mxu0 %vm692_vm2, %v941_v3 }
 0x2a1   : > { %v863_v8 = vpop.f32.mrf.mxu3 }
 0x2a6   : > { %1411 = vmatmul.msk.f32.vlgmr.msra.gmra.mxu0 %vm551_vm1, %v590_v42 }
 0x2a9   : > { %v990_v41 = vpop.f32.mrf.mxu3 }
 0x2ae   : > { %1417 = vmatmul.msk.f32.vlgmr.msrb.gmra.mxu0 %vm688_vm3, %v2099_v10 }
 0x31b   : > { %v789_v60 = vpop.f32.mrf.mxu0 }
 0x31c   : > { %v792_v5 = vadd.f32 %v789_v60, %v740_v4 }
 0x31e   : > { %v819_v7 = vadd.f32 %v816_v6, %v792_v5 }
 0x320   : > { %v866_v9 = vadd.f32 %v863_v8, %v819_v7 }
 0x323   : > { %v884_v61 = vpop.f32.mrf.mxu0 }
 0x324   : > { %v887_v62 = vmul.f32 2.0, %v884_v61 }
 0x326   : > { %v888_v63 = vsub.f32 %v887_v62, %v2109_v27 }
 0x328   : > { %1412 = vmatmul.msk.f32.vlgmr.msra.gmra.mxu1 %vm795_vm14, %v888_v63 }
 0x329   : > { %1132 = vmatpush.msra.mxu1 %v1423_v33 }
 0x32b   : > { %v1013_v34 = vpop.f32.mrf.mxu0 }
 0x32c   : > { %v1014_v42 = vadd.f32 %v1013_v34, %v990_v41 }
 0x330   : > { %1418 = vmatmul.msk.f32.vlgmr.msrb.gmra.mxu1 %vm551_vm1, %v2122_v52 }
 0x3a5   : > { %v912_v12 = vpop.f32.mrf.mxu1 }
 0x3a6   : > { %v915_v13 = vadd.f32 %v912_v12, %v866_v9 }
 0x3a8   : > { %v920_v14 = vadd.f32 %v1541_v11, %v915_v13 }
 0x3aa   : > { %v921_v16 = vsub.f32 0.0, %v920_v14 }
 0x3ac   : > { %v922_v17 = vmul.f32 1.442695, %v921_v16 }
 0x3ad   : > { %v1033_v18 = vpop.f32.mrf.mxu1 }
 0x3ae   : > { %1547 = vpow2.f32 %v922_v17  ;;  %v1036_v19 = vmul.f32 2.0, %v1033_v18 }
 0x3b0   : > { %v1037_v20 = vsub.f32 %v1036_v19, %v2099_v10 }
 0x3b2   : > { %1420 = vmatmul.msk.f32.vlgmr.msrb.gmra.mxu2 %vm688_vm3, %v1037_v20 }
 0x3b4   : > { %v1548_v21 = vpop.eup %1547 }
 0x3b5   : > { %v924_v22 = vadd.f32 1.0, %v1548_v21 }
 0x3b7   : > { %1549 = vrcp.f32 %v924_v22  ;;  %v936_v26 = vand.u32 2147483648, %v924_v22  ;;  %v934_v28 = vand.u32 2147483647, %v924_v22  ;;  %vm930_vm0 = vweird.f32 %v924_v22 }
 0x3b9   : > { %v937_v30 = vor.u32 1.1754944e-38, %v936_v26  ;;  %vm935_vm4 = vcmp.eq.f32.partialorder %v934_v28, 8.507059e+37 }
 0x3bd   : > { %v1550_v23 = vpop.eup %1549 }
 0x3be   : > { %v926_v24 = vmul.f32 %v1550_v23, %v924_v22  ;;  %vm931_vm15 = vweird.f32 %v1550_v23 }
 0x3bf   : > { %vm932_vm2 = vmor %vm930_vm0, %vm931_vm15 }
 0x3c0   : > { %v927_v25 = vsub.f32 1.0, %v926_v24 }
 0x3c2   : > { %v928_v27 = vmul.f32 %v1550_v23, %v927_v25 }
 0x3c4   : > { %v929_v29 = vadd.f32 %v1550_v23, %v928_v27 }
 0x3c6   : > { %v933_v31 = vsel %vm932_vm2, %v1550_v23, %v929_v29 }
 0x3c7   : > { %v938_v32 = vsel %vm935_vm4, %v937_v30, %v933_v31 }
 0x3c8   : > { %v940_v10 = vmul.f32 %v938_v32, %v540_v59  ;;  %v1197_v54 = vsub.f32 1.0, %v938_v32  ;;  %v1196_v56 = vmul.f32 %v1194_v53, %v938_v32 }
 0x3ca   : > { %1421 = vmatmul.msk.f32.vlgmr.msrb.gmra.mxu3 %vm551_vm1, %v940_v10  ;;  %1107 = vmatpush.msra.mxu0 %v940_v10 }
 0x3cb   : > { %1422 = vmatmul.msk.f32.vlgmr.msra.gmra.mxu0 %vm551_vm1, %v2122_v52 }
 0x435   : > { %v1063_v37 = vpop.f32.mrf.mxu2 }
 0x436   : > { %v1066_v44 = vadd.f32 %v1063_v37, %v1014_v42 }
 0x448   : > { %v1109_v35 = vpop.f32.mrf.mxu0 }
 0x449   : > { %1424 = vmatmul.msk.f32.vlgmr.msra.gmra.mxu1 %vm551_vm1, %v1109_v35  ;;  %1153 = vmatpush.msra.mxu2 %v1109_v35 }
 0x44a   : > { %1425 = vmatmul.msk.f32.vlgmr.msra.gmra.mxu2 %vm551_vm1, %v2122_v52 }
 0x44d   : > { %v1088_v43 = vpop.f32.mrf.mxu3 }
 0x44e   : > { %v1091_v46 = vadd.f32 %v1088_v43, %v1066_v44 }
 0x4c6   : > { %v1134_v45 = vpop.f32.mrf.mxu1 }
 0x4c7   : > { %v1137_v47 = vadd.f32 %v1134_v45, %v1091_v46 }
 0x4cd   : > { %v1155_v38 = vpop.f32.mrf.mxu2 }
 0x4ce   : > { %v1158_v39 = vmul.f32 2.0, %v1155_v38 }
 0x4d0   : > { %v1159_v40 = vsub.f32 %v1158_v39, %v940_v10 }
 0x4d2   : > { %1427 = vmatmul.msk.f32.vlgmr.msra.gmra.mxu3 %vm551_vm1, %v1159_v40 }
 0x555   : > { %v1182_v49 = vpop.f32.mrf.mxu3 }
 0x556   : > { %v1185_v50 = vadd.f32 %v1182_v49, %v1137_v47 }
 0x558   : > { %v1190_v51 = vadd.f32 %v1542_v48, %v1185_v50 }
 0x55a   : > { %1551 = vtanh.f32 %v1190_v51 }
 0x560   : > { %v1552_v52 = vpop.eup %1551 }
 0x561   : > { %1199 = vrot.lane.b32.xlu2 %v1552_v52, %s1857_s22  ;;  %s1777_s22 = sshra.s32 %s1225_s5, 4  ;;  %s1778_s22 = int_to_ptr.hbm [resolvable:$true] %s1777_s22 }
 0x562   : > { %s1779_s16 = scalar_lea.hbm %s1778_s22, 8  ;;  %p1784_p9 = scmp.lt.s32.totalorder %s1778_s22, %s2210_s11 }
 0x563   : > { %p1780_p1 = scmp.ne.s32.totalorder %s1778_s22, %s1779_s16  ;;  %p1785_p8 = scmp.lt.s32.totalorder %s1783_s24, %s1779_s16 }
 0x565   : > { %p1781_p12 = pnand %p1780_p1, %p2011_p5  ;;  %p1786_p10 = por %p1785_p8, %p1784_p9 }
 0x567   : > { %p1782_p7 = pneg %p1781_p12 }
 0x569   : > { %p1787_p11 = pnand %p1786_p10, %p1782_p7 }
 0x5bb   : > { %v1200_v55 = vpop.permute.xlu2 %1199 }
 0x5bc   : > { %v1202_v57 = vmul.f32 %v1200_v55, %v1197_v54 }
 0x5be   : > { %v1203_v58 = vadd.f32 %v1202_v57, %v1196_v56 }
 0x5c0   : > { %1205 = vrot.lane.b32.xlu2 %v1203_v58, %s1858_s20 }
 0x61a   : > { %v1206_v59 = vpop.permute.xlu2 %1205 }
 0x61b   : > { %1208 = vst.msk [vmem:[%s534_s8] sm:$0xff] %vm551_vm1, %v1206_v59 }
 0x61c   : > { %1790 = shalt.err (!%p1787_p11)
}
 0x61d   : > { %1456 = dma.vmem_to_hbm [thread:$0]  (%p2011_p5), %s1223_s23, 128, %s1225_s5, %s1210_s28  }
 0x61e PF: > { %s2239_s30 = sld [smem:[#allocation22_spill]]  ;;  %s1236_s4 = sand.u32 1, %s1833_s17  }
 0x61f   : > { %s1237_s15 = scalar_lea.sflag [#allocation4], %s1236_s4 }
 0x624   : > { %p2240_p4 = scmp.ge.s32.totalorder %s2239_s30, 2 }
 0x626   : > { %p1482_p13 = pnand %p2240_p4, %p2015_p6 }
 0x628   : > { %p1483_p0 = pneg %p1482_p13 }
 0x62a   : > { %1828 = dma.done.wait (%p1483_p0), %s1237_s15, 128  }
 0x62b   : > { %1830 = vsyncadd (%p1483_p0), %s1237_s15, 4294967168  ;;  %s2241_s20 = sld [smem:[#allocation23_spill]]  ;;  %s2244_s17 = smov %s1837_s18 }
 0x62c   : > { %s2242_s6 = sld [smem:[#allocation21_spill]] }
 0x62d   : > { %s2243_s19 = sld [smem:[#allocation24_spill]] }
 0x631   : > { %p29_p2 = scmp.ge.s32.totalorder %s2241_s20, 4  }
 0x632   : > { %s2245_s18 = smov %s2242_s6 }
 0x633   :  { %31 = sbr.rel (!%p29_p2) target bundleno = 15 (0xf), region = 154 }
 0x638   :  { %1243 = vsyncpa [#allocation3], 1 }
 0x639   :  { %1245 = vsyncpa [#allocation3 + $0x1], 1 }
 0x63a   :  { %1246 = vsyncpa [#allocation6], 1 }
 0x63b   :  { %1248 = vsyncpa [#allocation6 + $0x1], 1 }
 0x63c   :  { %1249 = vsyncpa [#allocation9], 1 }
 0x63d   :  { %1250 = vsyncpa [#allocation12], 1 }
 0x63e   :  { %1251 = vsyncpa [#allocation4], 1 }
 0x63f   :  { %1253 = vsyncpa [#allocation4 + $0x1], 1 }

</bundles_post_ra>
